<compile_context>
chip_gen: v5e
topology: v5e:2x2
jax: 0.10.0
libtpu: 0.0.40
codegen_flags: <defaults>
</compile_context>

<pallas_src>
import functools

import jax
import jax.numpy as jnp
from jax.experimental import pallas as pl
from jax.experimental.pallas import tpu as pltpu


def _fastnorm_kernel(x_ref, w_ref, b_ref, o_ref, *, eps, inv_n):
    # x_ref: (C, HW)  one batch sample, channels on sublanes, spatial on lanes
    # w_ref: (C, 1)   per-channel scale
    # b_ref: (C, 1)   per-channel shift
    # o_ref: (C, HW)
    x = x_ref[...].astype(jnp.float32)

    # mean over the whole sample (single group)
    mean = jnp.sum(x, keepdims=True) * inv_n            # (1, 1)
    xc = x - mean
    # biased variance (matches PyTorch GroupNorm)
    var = jnp.sum(xc * xc, keepdims=True) * inv_n        # (1, 1)
    inv_std = jax.lax.rsqrt(var + eps)                   # EUP

    y = xc * inv_std                                     # (C, HW)
    o_ref[...] = (y * w_ref[...] + b_ref[...]).astype(o_ref.dtype)


def fast_norm(x_nchw, weight, bias, *, eps=1e-5):
    """GroupNorm(1, C) forward.  x_nchw: (B, C, H, W); weight/bias: (C,)."""
    B, C, H, W = x_nchw.shape
    HW = H * W

    # Free contiguous reshape; spatial lands on the lane axis (HW >= 128 here).
    x2 = x_nchw.reshape(B, C, HW)
    w2 = weight.reshape(C, 1).astype(jnp.float32)
    b2 = bias.reshape(C, 1).astype(jnp.float32)

    kernel = functools.partial(_fastnorm_kernel, eps=float(eps),
                               inv_n=1.0 / float(C * HW))

    out = pl.pallas_call(
        kernel,
        out_shape=jax.ShapeDtypeStruct((B, C, HW), x_nchw.dtype),
        grid_spec=pltpu.PrefetchScalarGridSpec(
            num_scalar_prefetch=0,
            grid=(B,),
            in_specs=[
                pl.BlockSpec((None, C, HW), lambda b: (b, 0, 0)),  # x sample
                pl.BlockSpec((C, 1), lambda b: (0, 0)),            # weight
                pl.BlockSpec((C, 1), lambda b: (0, 0)),            # bias
            ],
            out_specs=pl.BlockSpec((None, C, HW), lambda b: (b, 0, 0)),
        ),
        compiler_params=pltpu.CompilerParams(
            dimension_semantics=("parallel",)),
    )(x2, w2, b2)

    return out.reshape(B, C, H, W)


def _reference(x, weight, bias, *, eps=1e-5):
    """Pure-JAX GroupNorm(1, C) matching PyTorch semantics (NCHW)."""
    B, C, H, W = x.shape
    xr = x.reshape(B, -1).astype(jnp.float32)
    mean = xr.mean(axis=1, keepdims=True)
    var = xr.var(axis=1, keepdims=True)          # biased variance
    y = (xr - mean) * jax.lax.rsqrt(var + eps)
    y = y.reshape(B, C, H, W)
    return y * weight[None, :, None, None] + bias[None, :, None, None]


if __name__ == "__main__":
    B, C, H, W = 2, 4, 16, 16

    key = jax.random.PRNGKey(0)
    kx, kw, kb = jax.random.split(key, 3)

    x = jax.random.normal(kx, (B, C, H, W), dtype=jnp.float32)
    # GroupNorm init is weight=1, bias=0; use non-trivial params to exercise
    # the affine path (forward semantics are identical either way).
    weight = 1.0 + 0.1 * jax.random.normal(kw, (C,), dtype=jnp.float32)
    bias = 0.1 * jax.random.normal(kb, (C,), dtype=jnp.float32)

    out = fast_norm(x, weight, bias, eps=1e-5)
    out = jax.block_until_ready(out)

    ref = _reference(x, weight, bias, eps=1e-5)
    assert out.shape == (B, C, H, W), out.shape
    err = float(jnp.max(jnp.abs(out - ref)))
    assert jnp.allclose(out, ref, atol=1e-5, rtol=1e-5), err

    print("KERNEL_OK")
</pallas_src>

<mosaic_0001>
module attributes {stable_mosaic.version = 11 : i64} {
  func.func @_fastnorm_kernel(%arg0: i32, %arg1: memref<1x4x256xf32, #tpu.memory_space<vmem>>, %arg2: memref<4x1xf32, #tpu.memory_space<vmem>>, %arg3: memref<4x1xf32, #tpu.memory_space<vmem>>, %arg4: memref<1x4x256xf32, #tpu.memory_space<vmem>>) attributes {dimension_semantics = [#tpu.dimension_semantics<parallel>], iteration_bounds = array<i64: 2>, scalar_prefetch = 0 : i64, scratch_operands = 0 : i64, tpu.core_type = #tpu.core_type<tc>, window_params = [{transform_indices = @transform_0, window_bounds = array<i64: 1, 4, 256>}, {pipeline_mode = #tpu.pipeline_mode<synchronous>, transform_indices = @transform_1, window_bounds = array<i64: 4, 1>}, {pipeline_mode = #tpu.pipeline_mode<synchronous>, transform_indices = @transform_2, window_bounds = array<i64: 4, 1>}, {transform_indices = @transform_3, window_bounds = array<i64: 1, 4, 256>}]} {
    %c0 = arith.constant 0 : index
    %c0_0 = arith.constant 0 : index
    %c0_1 = arith.constant 0 : index
    %0 = vector.load %arg1[%c0, %c0_0, %c0_1] : memref<1x4x256xf32, #tpu.memory_space<vmem>>, vector<1x4x256xf32>
    %1 = vector.shape_cast %0 : vector<1x4x256xf32> to vector<4x256xf32>
    %2 = vector.shape_cast %1 : vector<4x256xf32> to vector<1x4x256xf32>
    %cst = arith.constant dense<0.000000e+00> : vector<1xf32>
    %3 = vector.multi_reduction <add>, %2, %cst [1, 2] : vector<1x4x256xf32> to vector<1xf32>
    %4 = vector.shape_cast %3 : vector<1xf32> to vector<1x1x1xf32>
    %5 = vector.extract %4[0, 0, 0] : f32 from vector<1x1x1xf32>
    %6 = vector.broadcast %5 : f32 to vector<1x1xf32>
    %cst_2 = arith.constant 9.765625E-4 : f32
    %7 = vector.broadcast %cst_2 : f32 to vector<1x1xf32>
    %8 = arith.mulf %6, %7 : vector<1x1xf32>
    %9 = vector.broadcast %8 : vector<1x1xf32> to vector<4x256xf32>
    %10 = arith.subf %1, %9 : vector<4x256xf32>
    %11 = arith.mulf %10, %10 : vector<4x256xf32>
    %12 = vector.shape_cast %11 : vector<4x256xf32> to vector<1x4x256xf32>
    %cst_3 = arith.constant dense<0.000000e+00> : vector<1xf32>
    %13 = vector.multi_reduction <add>, %12, %cst_3 [1, 2] : vector<1x4x256xf32> to vector<1xf32>
    %14 = vector.shape_cast %13 : vector<1xf32> to vector<1x1x1xf32>
    %15 = vector.extract %14[0, 0, 0] : f32 from vector<1x1x1xf32>
    %16 = vector.broadcast %15 : f32 to vector<1x1xf32>
    %cst_4 = arith.constant 9.765625E-4 : f32
    %17 = vector.broadcast %cst_4 : f32 to vector<1x1xf32>
    %18 = arith.mulf %16, %17 : vector<1x1xf32>
    %cst_5 = arith.constant 9.99999974E-6 : f32
    %19 = vector.broadcast %cst_5 : f32 to vector<1x1xf32>
    %20 = arith.addf %18, %19 : vector<1x1xf32>
    %21 = math.rsqrt %20 : vector<1x1xf32>
    %22 = vector.broadcast %21 : vector<1x1xf32> to vector<4x256xf32>
    %23 = arith.mulf %10, %22 : vector<4x256xf32>
    %c0_6 = arith.constant 0 : index
    %c0_7 = arith.constant 0 : index
    %24 = vector.load %arg2[%c0_6, %c0_7] : memref<4x1xf32, #tpu.memory_space<vmem>>, vector<4x1xf32>
    %25 = vector.broadcast %24 : vector<4x1xf32> to vector<4x256xf32>
    %26 = arith.mulf %23, %25 : vector<4x256xf32>
    %c0_8 = arith.constant 0 : index
    %c0_9 = arith.constant 0 : index
    %27 = vector.load %arg3[%c0_8, %c0_9] : memref<4x1xf32, #tpu.memory_space<vmem>>, vector<4x1xf32>
    %28 = vector.broadcast %27 : vector<4x1xf32> to vector<4x256xf32>
    %29 = arith.addf %26, %28 : vector<4x256xf32>
    %c0_10 = arith.constant 0 : index
    %c0_11 = arith.constant 0 : index
    %c0_12 = arith.constant 0 : index
    %30 = vector.load %arg4[%c0_10, %c0_11, %c0_12] : memref<1x4x256xf32, #tpu.memory_space<vmem>>, vector<1x4x256xf32>
    %31 = vector.shape_cast %30 : vector<1x4x256xf32> to vector<4x256xf32>
    %32 = vector.shape_cast %29 : vector<4x256xf32> to vector<1x4x256xf32>
    tpu.vector_store %arg4[%c0_10, %c0_11, %c0_12], %32 {strides = array<i32>} : memref<1x4x256xf32, #tpu.memory_space<vmem>>, vector<1x4x256xf32>,
    return
  }
  func.func @transform_0(%arg0: i32) -> (i32, i32, i32) {
    %c0_i32 = arith.constant 0 : i32
    %c0_i32_0 = arith.constant 0 : i32
    %c0_i32_1 = arith.constant 0 : i32
    return %arg0, %c0_i32, %c0_i32_0 : i32, i32, i32
  }
  func.func @transform_1(%arg0: i32) -> (i32, i32) {
    %c0_i32 = arith.constant 0 : i32
    %c0_i32_0 = arith.constant 0 : i32
    %c0_i32_1 = arith.constant 0 : i32
    return %c0_i32, %c0_i32_0 : i32, i32
  }
  func.func @transform_2(%arg0: i32) -> (i32, i32) {
    %c0_i32 = arith.constant 0 : i32
    %c0_i32_0 = arith.constant 0 : i32
    %c0_i32_1 = arith.constant 0 : i32
    return %c0_i32, %c0_i32_0 : i32, i32
  }
  func.func @transform_3(%arg0: i32) -> (i32, i32, i32) {
    %c0_i32 = arith.constant 0 : i32
    %c0_i32_0 = arith.constant 0 : i32
    %c0_i32_1 = arith.constant 0 : i32
    return %arg0, %c0_i32, %c0_i32_0 : i32, i32, i32
  }
}

</mosaic_0001>

<bundles_post_ra>
// kernel: tpu_custom_call.1
= control target key start
LH: loop header
LB: loop body
LE: loop exit
PB: predicated region body
PF: predicated region fallthrough
CT: control target
= control target key end

     0   :  { %8 = vsyncpa [#allocation3], 0  ;;  %s688_s0 = inlined_call_operand.hbm [shape: f32[2,4,256], index: 0, kind: input, shape index: {}]   ;;  %s689_s1 = inlined_call_operand.vmem [shape: f32[4,1], index: 1, kind: input, shape index: {}]   ;;  %s690_s2 = inlined_call_operand.vmem [shape: f32[4,1], index: 2, kind: input, shape index: {}]   ;;  %s691_s3 = inlined_call_operand.hbm [shape: f32[2,4,256], index: 3, kind: output, shape index: {}]  }
   0x1   :  { %10 = vsyncpa [#allocation3 + $0x1], 0 }
   0x2   :  { %11 = vsyncpa [#allocation4], 0 }
   0x3   :  { %13 = vsyncpa [#allocation4 + $0x1], 0  ;;  %s547_s12 = smov 0   ;;  %s549_s13 = smov 0  }
   0x4   :  { %s551_s14 = smov 0   ;;  %s553_s15 = smov 0  }
   0x5 LB: > { %s568_s16 = sadd.s32 4294967295, %s523_s15   ;;  %s355_s17 = sadd.s32 4294967294, %s523_s15   ;;  %s523_s15 = sphi %s553_s15, %s701_s15   ;;  %s519_s14 = sphi %s551_s14, %s700_s14   ;;  %s515_s13 = sphi %s549_s13, %s699_s13   ;;  %s511_s12 = sphi %s547_s12, %s698_s12  }
   0x6   : > { %s572_s18 = sadd.s32 1, %s523_s15   ;;  %s26_s19 = sadd.s32 1, %s519_s14 }
   0x7   : > { %s23_s20 = ssub.s32 %s523_s15, %s572_s18  ;;  %p33_p0 = scmp.ne.s32.totalorder %s519_s14, %s515_s13 }
   0x8   : > { %p24_p1 = scmp.eq.s32.totalorder %s23_s20, 0  ;;  %p34_p2 = scmp.eq.s32.totalorder %s523_s15, 0 }
   0x9   : > { %p39_p3 = scmp.ne.s32.totalorder %s515_s13, %s511_s12  ;;  %p40_p4 = scmp.eq.s32.totalorder %s568_s16, 0 }
   0xa   : > { %s584_s21 = scalar_select %p24_p1, %s519_s14, %s26_s19  }
   0xb   : > { %p586_p5 = por %p34_p2, %p33_p0  ;;  %p590_p6 = por %p40_p4, %p39_p3 }
   0xc   : > { %p105_p7 = scmp.eq.s32.totalorder %s568_s16, 1  ;;  %p111_p8 = scmp.eq.s32.totalorder %s355_s17, 1 }
   0xd   : > { %p387_p10 = scmp.lt.s32.totalorder %s523_s15, 2  ;;  %s137_s26 = sand.u32 1, %s519_s14  }
   0xe   : > { %p597_p11 = por %p105_p7, %p33_p0  ;;  %p601_p12 = por %p111_p8, %p39_p3 }
   0xf   : > { %s369_s27 = sshll.u32 %s523_s15, 3  ;;  %s358_s28 = sshll.u32 %s137_s26, 3 }
  0x10   : > { %s146_s4 = scalar_lea.hbm %s688_s0, %s369_s27  ;;  %s141_s6 = scalar_lea.vmem [#allocation2], %s358_s28 }
  0x11   : > { %s148_s5 = sshll.u32 %s146_s4, 4  ;;  %s150_s7 = sshll.u32 %s141_s6, 4  ;;  %s149_s5 = int_to_ptr.hbm [resolvable:$true] %s148_s5  ;;  %s151_s7 = int_to_ptr.vmem [resolvable:$true] %s150_s7 }
  0x12   : > { %p612_p13 = pnand %p387_p10, %p586_p5  ;;  %p361_p0 = scmp.ge.s32.totalorder %s523_s15, 1 }
  0x13   : > { %p155_p1 = scmp.lt.s32.totalorder %s523_s15, 3  ;;  %s138_s9 = scalar_lea.sflag [#allocation3], %s137_s26 }
  0x14   : > { %s427_s10 = sshra.s32 %s149_s5, 4  ;;  %p431_p3 = pneg %p612_p13  ;;  %s428_s10 = int_to_ptr.hbm [resolvable:$true] %s427_s10 }
  0x15   : > { %s429_s11 = scalar_lea.hbm %s428_s10, 8  ;;  %s434_s20 = scalar_lea.hbm %s688_s0, 16 }
  0x16   : > { %p430_p2 = scmp.ne.s32.totalorder %s428_s10, %s429_s11  ;;  %p435_p5 = scmp.lt.s32.totalorder %s428_s10, %s688_s0 }
  0x17   : > { %p436_p8 = scmp.lt.s32.totalorder %s434_s20, %s429_s11 }
  0x18   : > { %p432_p4 = pnand %p431_p3, %p430_p2 }
  0x19   : > { %p437_p10 = por %p436_p8, %p435_p5 }
  0x1a   : > { %p433_p7 = pneg %p432_p4 }
  0x1c   : > { %p438_p9 = pnand %p437_p10, %p433_p7 }
  0x1e   : > { %441 = shalt.err (!%p438_p9)
}
  0x1f   : > { %382 = dma.hbm_to_vmem [thread:$0]  (!%p612_p13), %s149_s5, 128, %s151_s7, %s138_s9  }
  0x20   : > { %p156_p2 = pnand %p361_p0, %p155_p1 }
  0x21   : > { %s633_s26 = sand.u32 (!%p156_p2), 1, %s515_s13  }
  0x22   : > { %159 = sbr.rel (%p156_p2) target bundleno = 458 (0x1ca), region = 32  ;;  %s362_s28 = sshll.u32 (!%p156_p2), %s633_s26, 3 }
  0x23   : > { %s162_s29 = scalar_lea.sflag (!%p156_p2), [#allocation3], %s633_s26  ;;  %s165_s30 = scalar_lea.vmem (!%p156_p2), [#allocation2], %s362_s28 }
  0x27   : > { %502 = dma.done.wait (%p590_p6), %s162_s29, 128  }
  0x28   : > { %504 = vsyncadd (%p590_p6), %s162_s29, 4294967168  ;;  %v189_v0 = vld [vmem:[%s165_s30] sm:$0xff]  ;;  %vm196_vm0 = vcmask 1043456   ;;  %v245_v13 = vld [vmem:[%s689_s1] sm:$0xf]  ;;  %v525_v14 = vmov 0  }
  0x29   : > { %191 = vst [vmem:[#allocation1] ss:$2 sm:$0xff] %v189_v0  ;;  %423 = vset.pattern.permute.xlu1 %v525_v14  ;;  %424 = vset.pattern.permute.xlu0 %v525_v14  ;;  %v256_v15 = vld [vmem:[%s690_s2] sm:$0xf]  ;;  %v526_v39 = vmov 839922192  }
  0x2a   : > { %248 = vperm.xlu1 %423, %v245_v13   ;;  %v251_v40 = vunpack.c.l.s4 %v526_v39  ;;  %s370_s9 = sshll.u32 %s568_s16, 3  ;;  %s188_s19 = scalar_lea.vmem [#allocation5], %s362_s28 }
  0x2b   : > { %s280_s17 = scalar_lea.hbm %s691_s3, %s370_s9  ;;  %s282_s20 = sshll.u32 %s188_s19, 4  ;;  %s283_s20 = int_to_ptr.vmem [resolvable:$true] %s282_s20 }
  0x2c   : > { %v252_v43 = vunpack.c.0.s8 %v251_v40  ;;  %s284_s22 = sshll.u32 %s280_s17, 4  ;;  %s269_s16 = scalar_lea.sflag [#allocation4], %s633_s26  ;;  %s285_s22 = int_to_ptr.hbm [resolvable:$true] %s284_s22 }
  0x2d   : > { %s471_s27 = sshra.s32 %s285_s22, 4  ;;  %s477_s28 = scalar_lea.hbm %s691_s3, 16  ;;  %s472_s27 = int_to_ptr.hbm [resolvable:$true] %s471_s27 }
  0x2e   : > { %s473_s29 = scalar_lea.hbm %s472_s27, 8  ;;  %p478_p0 = scmp.lt.s32.totalorder %s472_s27, %s691_s3 }
  0x2f   : > { %p474_p6 = scmp.ne.s32.totalorder %s472_s27, %s473_s29  ;;  %p479_p1 = scmp.lt.s32.totalorder %s477_s28, %s473_s29 }
  0x30   : > { %v192_v1 = vld.sshfl [vmem:[#allocation1] sm:$0xff pattern:$0x75316420]  ;;  %v193_v2 = vld.sshfl [vmem:[#allocation1 + $0x8] sm:$0xff pattern:$0x75316420] }
  0x31   : > { %v197_v3 = vsel %vm196_vm0, %v192_v1, 0.0  ;;  %v198_v4 = vsel %vm196_vm0, %v193_v2, 0.0  ;;  %p475_p9 = pnand %p474_p6, %p597_p11  ;;  %p480_p3 = por %p479_p1, %p478_p0 }
  0x32   : > { %v199_v5 = vadd.f32 %v198_v4, %v197_v3  ;;  %259 = vperm.xlu1 %423, %v256_v15  }
  0x33   : > { %p476_p13 = pneg %p475_p9 }
  0x34   : > { %200 = vadd.xlane.f32.xlu0 %v199_v5 }
  0x35   : > { %p481_p4 = pnand %p480_p3, %p476_p13 }
  0x9c   : > { %v249_v37 = vpop.permute.xlu1 %248 }
  0x9d   : > { %v253_v48 = vperm.slane %v249_v37, %v252_v43 }
  0xa4   : > { %v260_v46 = vpop.permute.xlu1 %259 }
  0xa5   : > { %v264_v50 = vperm.slane %v260_v46, %v252_v43 }
  0xa7   : > { %v201_v6 = vpop.xlane.xlu0 %200 }
  0xa8   : > { %v202_v7 = vrot.slane %v201_v6, 4 }
  0xaa   : > { %v203_v8 = vadd.f32 %v202_v7, %v201_v6 }
  0xac   : > { %v204_v9 = vrot.slane %v203_v8, 2 }
  0xae   : > { %v205_v10 = vadd.f32 %v204_v9, %v203_v8 }
  0xb0   : > { %v206_v11 = vrot.slane %v205_v10, 1 }
  0xb2   : > { %v207_v12 = vadd.f32 %v206_v11, %v205_v10 }
  0xb4   : > { %371 = vpush %v207_v12 }
  0xe5   : > { %s372_s7 = spop %371 }
  0xe6   : > { %v209_v16 = vstv %s372_s7 }
  0xe7   : > { %v210_v17 = vmul.f32 0.0009765625, %v209_v16 }
  0xe9   : > { %v211_v18 = vsub.f32 %v189_v0, %v210_v17 }
  0xeb   : > { %v212_v19 = vmul.f32 %v211_v18, %v211_v18 }
  0xed   : > { %214 = vst [vmem:[#allocation1] ss:$2 sm:$0xff] %v212_v19 }
  0xf4   : > { %v215_v20 = vld.sshfl [vmem:[#allocation1] sm:$0xff pattern:$0x75316420]  ;;  %v216_v21 = vld.sshfl [vmem:[#allocation1 + $0x8] sm:$0xff pattern:$0x75316420] }
  0xf5   : > { %v219_v22 = vsel %vm196_vm0, %v215_v20, 0.0  ;;  %v220_v23 = vsel %vm196_vm0, %v216_v21, 0.0 }
  0xf6   : > { %v221_v24 = vadd.f32 %v220_v23, %v219_v22 }
  0xf8   : > { %222 = vadd.xlane.f32.xlu0 %v221_v24 }
 0x16b   : > { %v223_v25 = vpop.xlane.xlu0 %222 }
 0x16c   : > { %v224_v26 = vrot.slane %v223_v25, 4 }
 0x16e   : > { %v225_v27 = vadd.f32 %v224_v26, %v223_v25 }
 0x170   : > { %v226_v28 = vrot.slane %v225_v27, 2 }
 0x172   : > { %v227_v29 = vadd.f32 %v226_v28, %v225_v27 }
 0x174   : > { %v228_v30 = vrot.slane %v227_v29, 1 }
 0x176   : > { %v229_v31 = vadd.f32 %v228_v30, %v227_v29 }
 0x178   : > { %373 = vpush %v229_v31 }
 0x1a9   : > { %s374_s8 = spop %373 }
 0x1aa   : > { %v231_v32 = vstv %s374_s8 }
 0x1ab   : > { %v232_v33 = vmul.f32 0.0009765625, %v231_v32 }
 0x1ad   : > { %v233_v34 = vadd.f32 1e-05, %v232_v33 }
 0x1af   : > { %425 = vrsqrt.f32 %v233_v34  ;;  %vm240_vm2 = vweird.f32 %v233_v34 }
 0x1b5   : > { %v426_v35 = vpop.eup %425 }
 0x1b6   : > { %v235_v36 = vmul.f32 %v426_v35, %v233_v34  ;;  %vm241_vm1 = vweird.f32 %v426_v35 }
 0x1b7   : > { %vm242_vm3 = vmor %vm240_vm2, %vm241_vm1 }
 0x1b8   : > { %v236_v38 = vmul.f32 %v426_v35, %v235_v36 }
 0x1ba   : > { %v237_v41 = vmul.f32 0.5, %v236_v38 }
 0x1bc   : > { %v238_v42 = vsub.f32 1.5, %v237_v41 }
 0x1be   : > { %v239_v44 = vmul.f32 %v426_v35, %v238_v42 }
 0x1c0   : > { %v243_v45 = vsel %vm242_vm3, %v426_v35, %v239_v44 }
 0x1c1   : > { %v244_v47 = vmul.f32 %v243_v45, %v211_v18 }
 0x1c3   : > { %v255_v49 = vmul.f32 %v253_v48, %v244_v47 }
 0x1c5   : > { %v266_v51 = vadd.f32 %v264_v50, %v255_v49 }
 0x1c7   : > { %267 = vst [vmem:[%s188_s19] sm:$0xff] %v266_v51 }
 0x1c8   : > { %484 = shalt.err (!%p481_p4)
}
 0x1c9   : > { %377 = dma.vmem_to_hbm [thread:$0]  (%p597_p11), %s283_s20, 128, %s285_s22, %s269_s16  }
 0x1ca PF: > { %s296_s26 = sand.u32 1, %s511_s12   ;;  %p697_p7 = scmp.ge.s32.totalorder %s523_s15, 2 }
 0x1cb   : > { %s297_s6 = scalar_lea.sflag [#allocation4], %s296_s26 }
 0x1cc   : > { %p384_p5 = pnand %p697_p7, %p601_p12 }
 0x1ce   : > { %p385_p8 = pneg %p384_p5 }
 0x1d0   : > { %506 = dma.done.wait (%p385_p8), %s297_s6, 128  }
 0x1d1   : > { %508 = vsyncadd (%p385_p8), %s297_s6, 4294967168  ;;  %p16_p10 = scmp.ge.s32.totalorder %s572_s18, 4   ;;  %s698_s12 = smov %s515_s13 }
 0x1d2   : > { %s699_s13 = smov %s519_s14  ;;  %s700_s14 = smov %s584_s21 }
 0x1d3   : > { %s701_s15 = smov %s572_s18  ;;  %18 = sbr.rel (!%p16_p10) target bundleno = 5 (0x5), region = 77 }
 0x1d8   :  { %303 = vsyncpa [#allocation3], 1 }
 0x1d9   :  { %305 = vsyncpa [#allocation3 + $0x1], 1 }
 0x1da   :  { %306 = vsyncpa [#allocation4], 1 }
 0x1db   :  { %308 = vsyncpa [#allocation4 + $0x1], 1 }

</bundles_post_ra>
